<compile_context>
chip_gen: v5e
topology: v5e:2x2
jax: 0.10.0
libtpu: 0.0.40
codegen_flags: <defaults>
</compile_context>

<pallas_src>
import jax
import jax.numpy as jnp
from jax.experimental import pallas as pl
from jax.experimental.pallas import tpu as pltpu


def highway_kernel(x_ref, w_ref, b_ref, o_ref):
    E = x_ref.shape[-1]

    # Skip path in f32 regardless of the activation I/O dtype.
    x_f32 = x_ref[...].astype(jnp.float32)                      # (bm, E)

    # One fused MXU pass over the concatenated [Wp^T | Wg^T] weights:
    # bf16 inputs, f32 accumulation.
    y = jnp.dot(x_ref[...].astype(jnp.bfloat16), w_ref[...],
                preferred_element_type=jnp.float32) + b_ref[...]  # (bm, 2E) f32

    proj = jnp.maximum(y[:, :E], 0.0)                            # relu(x @ Wp + bp)
    gate = jax.nn.sigmoid(y[:, E:])                              # sigmoid(x @ Wg + bg) (EUP)

    # highway combine: x + gate*(proj - x) == gate*proj + (1-gate)*x
    # dropout is identity in eval mode.
    o_ref[...] = (x_f32 + gate * (proj - x_f32)).astype(o_ref.dtype)


def prepare_highway_params(w_proj, b_proj, w_gate, b_gate, weight_dtype=jnp.bfloat16):
    """One-time conversion of torch-layout Linear params to kernel-ready layout.

    torch nn.Linear stores weights as (out_features, in_features); the kernel wants
    x @ W with W = (in, out). Projection and gate weights are fused along the output
    (N) axis so the kernel does a single (E, 2E) matmul.
    """
    E = w_proj.shape[0]
    w_fused = jnp.concatenate([w_proj.T, w_gate.T], axis=1).astype(weight_dtype)  # (E, 2E)
    b_fused = jnp.concatenate([b_proj, b_gate]).reshape(1, 2 * E).astype(jnp.float32)
    return w_fused, b_fused


def _round_up(v, m):
    return ((v + m - 1) // m) * m


def _choose_block_b(B, block_b):
    """Pick an 8-aligned batch tile; ensure >=2 grid steps when B is large (v7x megacore)."""
    block_b = max(8, (block_b // 8) * 8)
    if B > block_b:
        return block_b                                  # >= 2 grid steps automatically
    if B >= 64 and B % 8 == 0:
        return min(_round_up(pl.cdiv(B, 2), 8), B)      # split so both v7x TCs get work
    return B                                            # full-extent block (small batches)


def highway_forward(x, w_fused, b_fused, *, block_b=1024, activation_dtype=None):
    """Fused highway forward.

    x:        (..., E) float32 (leading dims are flattened into one batch axis).
    w_fused:  (E, 2E) bf16 [Wp^T | Wg^T].
    b_fused:  (1, 2E) f32.
    activation_dtype: None keeps the input dtype for activation I/O; jnp.bfloat16 halves
      HBM traffic (mem-bound win, biggest on v5e) at the cost of bf16 residual precision.
    """
    orig_shape = x.shape
    E = orig_shape[-1]
    assert w_fused.shape == (E, 2 * E)
    assert b_fused.shape == (1, 2 * E)
    assert E % 128 == 0, "embed_size must be a multiple of 128 for lane-aligned slicing"

    x2 = x.reshape(-1, E)
    if activation_dtype is not None:
        x2 = x2.astype(activation_dtype)
    io_dtype = x2.dtype
    B = x2.shape[0]

    bb = _choose_block_b(B, block_b)
    assert bb == B or bb % 8 == 0
    grid = (pl.cdiv(B, bb),)

    # VMEM budget from the actual post-clamp tile sizes (no artificial floor/clip).
    io_itemsize = jnp.dtype(io_dtype).itemsize
    w_itemsize = jnp.dtype(w_fused.dtype).itemsize
    vmem_bytes = (
        2 * bb * E * io_itemsize            # x tiles, double-buffered
        + 2 * bb * E * io_itemsize          # out tiles, double-buffered
        + 2 * E * (2 * E) * w_itemsize      # fused weights (constant block index)
        + 2 * (2 * E) * 4                   # fused bias
        + 3 * bb * (2 * E) * 4              # kernel f32 temporaries (y / proj / gate / skip)
        + (4 << 20)                         # compiler scratch slack
    )
    # Keep a healthy margin below v7x's 64 MiB physical VMEM.
    vmem_limit = int(min(max(vmem_bytes, 8 << 20), 56 << 20))

    out = pl.pallas_call(
        highway_kernel,
        out_shape=jax.ShapeDtypeStruct((B, E), io_dtype),
        grid_spec=pltpu.PrefetchScalarGridSpec(
            num_scalar_prefetch=0,
            grid=grid,
            in_specs=[
                pl.BlockSpec((bb, E), lambda i: (i, 0)),        # x tile
                pl.BlockSpec((E, 2 * E), lambda i: (0, 0)),     # fused weights (fetched once)
                pl.BlockSpec((1, 2 * E), lambda i: (0, 0)),     # fused bias (fetched once)
            ],
            out_specs=pl.BlockSpec((bb, E), lambda i: (i, 0)),
        ),
        compiler_params=pltpu.CompilerParams(
            dimension_semantics=("parallel",),
            vmem_limit_bytes=vmem_limit,
        ),
    )(x2, w_fused, b_fused)

    return out.reshape(orig_shape[:-1] + (E,))


def highway_reference(x, w_proj, b_proj, w_gate, b_gate):
    proj = jax.nn.relu(x @ w_proj.T + b_proj)
    gate = jax.nn.sigmoid(x @ w_gate.T + b_gate)
    return gate * proj + (1.0 - gate) * x


if __name__ == "__main__":
    embed = 128  # embed_size; dropout_rate is unused in the eval-mode forward.

    key = jax.random.PRNGKey(0)
    kx, kwp, kbp, kwg, kbg, kx2 = jax.random.split(key, 6)

    # Deterministic "Linear" parameter init (torch layout: (out_features, in_features)).
    bound = 1.0 / (embed ** 0.5)
    w_proj = jax.random.uniform(kwp, (embed, embed), jnp.float32, -bound, bound)
    b_proj = jax.random.uniform(kbp, (embed,), jnp.float32, -bound, bound)
    w_gate = jax.random.uniform(kwg, (embed, embed), jnp.float32, -bound, bound)
    b_gate = jax.random.uniform(kbg, (embed,), jnp.float32, -bound, bound)

    # One-time parameter prep (transpose + fuse + bf16 cast), outside the per-call path.
    w_fused, b_fused = prepare_highway_params(w_proj, b_proj, w_gate, b_gate)

    # 1) Small batch (grid of 1), matching the module's (batch_size, embed_size) contract.
    x_small = jax.random.normal(kx, (8, embed), dtype=jnp.float32)
    out_small = jax.block_until_ready(highway_forward(x_small, w_fused, b_fused))
    ref_small = highway_reference(x_small, w_proj, b_proj, w_gate, b_gate)
    assert out_small.shape == (8, embed)
    assert jnp.allclose(out_small, ref_small, atol=5e-2, rtol=5e-2), "small-batch mismatch"

    # 2) Multi-tile batch: exercises the >=2-step grid (v7x megacore sharding path).
    x_big = jax.random.normal(kx2, (272, embed), dtype=jnp.float32)
    out_big = jax.block_until_ready(highway_forward(x_big, w_fused, b_fused))
    ref_big = highway_reference(x_big, w_proj, b_proj, w_gate, b_gate)
    assert out_big.shape == (272, embed)
    assert jnp.allclose(out_big, ref_big, atol=5e-2, rtol=5e-2), "multi-tile mismatch"

    # 3) Optional bf16 activation-I/O path (halves HBM traffic on this mem-bound kernel).
    out_bf16 = jax.block_until_ready(
        highway_forward(x_big, w_fused, b_fused, activation_dtype=jnp.bfloat16))
    assert out_bf16.dtype == jnp.bfloat16
    assert jnp.allclose(out_bf16.astype(jnp.float32), ref_big, atol=1.5e-1, rtol=1.5e-1), \
        "bf16-I/O mismatch"

    print("KERNEL_OK")
</pallas_src>

<mosaic_0001>
module attributes {stable_mosaic.version = 11 : i64} {
  func.func @highway_kernel(%arg0: i32, %arg1: memref<8x128xf32, #tpu.memory_space<vmem>>, %arg2: memref<128x256xbf16, #tpu.memory_space<vmem>>, %arg3: memref<1x256xf32, #tpu.memory_space<vmem>>, %arg4: memref<8x128xf32, #tpu.memory_space<vmem>>) attributes {dimension_semantics = [#tpu.dimension_semantics<parallel>], iteration_bounds = array<i64: 1>, scalar_prefetch = 0 : i64, scratch_operands = 0 : i64, tpu.core_type = #tpu.core_type<tc>, window_params = [{transform_indices = @transform_0, window_bounds = array<i64: 8, 128>}, {pipeline_mode = #tpu.pipeline_mode<synchronous>, transform_indices = @transform_1, window_bounds = array<i64: 128, 256>}, {pipeline_mode = #tpu.pipeline_mode<synchronous>, transform_indices = @transform_2, window_bounds = array<i64: 1, 256>}, {transform_indices = @transform_3, window_bounds = array<i64: 8, 128>}]} {
    %c0 = arith.constant 0 : index
    %c0_0 = arith.constant 0 : index
    %0 = vector.load %arg1[%c0, %c0_0] : memref<8x128xf32, #tpu.memory_space<vmem>>, vector<8x128xf32>
    %c0_1 = arith.constant 0 : index
    %c0_2 = arith.constant 0 : index
    %1 = vector.load %arg1[%c0_1, %c0_2] : memref<8x128xf32, #tpu.memory_space<vmem>>, vector<8x128xf32>
    %2 = arith.truncf %1 : vector<8x128xf32> to vector<8x128xbf16>
    %c0_3 = arith.constant 0 : index
    %c0_4 = arith.constant 0 : index
    %3 = vector.load %arg2[%c0_3, %c0_4] : memref<128x256xbf16, #tpu.memory_space<vmem>>, vector<128x256xbf16>
    %cst = arith.constant dense<0.000000e+00> : vector<8x256xf32>
    %4 = tpu.matmul %2, %3, %cst {dimension_numbers = #tpu.dot_dimension_numbers<[1], [0], [0], [1], [0, 0, 1, 1], [], []>} : vector<8x128xbf16>, vector<128x256xbf16>, vector<8x256xf32> -> vector<8x256xf32>
    %c0_5 = arith.constant 0 : index
    %c0_6 = arith.constant 0 : index
    %5 = vector.load %arg3[%c0_5, %c0_6] : memref<1x256xf32, #tpu.memory_space<vmem>>, vector<1x256xf32>
    %6 = vector.broadcast %5 : vector<1x256xf32> to vector<8x256xf32>
    %7 = arith.addf %4, %6 : vector<8x256xf32>
    %8 = vector.extract_strided_slice %7 {offsets = [0, 0], sizes = [8, 128], strides = [1, 1]} : vector<8x256xf32> to vector<8x128xf32>
    %cst_7 = arith.constant 0.000000e+00 : f32
    %9 = vector.broadcast %cst_7 : f32 to vector<8x128xf32>
    %10 = arith.maximumf %8, %9 : vector<8x128xf32>
    %11 = vector.extract_strided_slice %7 {offsets = [0, 128], sizes = [8, 128], strides = [1, 1]} : vector<8x256xf32> to vector<8x128xf32>
    %12 = arith.negf %11 : vector<8x128xf32>
    %13 = math.exp %12 : vector<8x128xf32>
    %cst_8 = arith.constant 1.000000e+00 : f32
    %14 = vector.broadcast %cst_8 : f32 to vector<8x128xf32>
    %15 = arith.addf %14, %13 : vector<8x128xf32>
    %16 = arith.divf %14, %15 : vector<8x128xf32>
    %17 = arith.subf %10, %0 : vector<8x128xf32>
    %18 = arith.mulf %16, %17 : vector<8x128xf32>
    %19 = arith.addf %0, %18 : vector<8x128xf32>
    %c0_9 = arith.constant 0 : index
    %c0_10 = arith.constant 0 : index
    %20 = vector.load %arg4[%c0_9, %c0_10] : memref<8x128xf32, #tpu.memory_space<vmem>>, vector<8x128xf32>
    tpu.vector_store %arg4[%c0_9, %c0_10], %19 {strides = array<i32>} : memref<8x128xf32, #tpu.memory_space<vmem>>, vector<8x128xf32>,
    return
  }
  func.func @transform_0(%arg0: i32) -> (i32, i32) {
    %c0_i32 = arith.constant 0 : i32
    %c0_i32_0 = arith.constant 0 : i32
    return %arg0, %c0_i32 : i32, i32
  }
  func.func @transform_1(%arg0: i32) -> (i32, i32) {
    %c0_i32 = arith.constant 0 : i32
    %c0_i32_0 = arith.constant 0 : i32
    %c0_i32_1 = arith.constant 0 : i32
    return %c0_i32, %c0_i32_0 : i32, i32
  }
  func.func @transform_2(%arg0: i32) -> (i32, i32) {
    %c0_i32 = arith.constant 0 : i32
    %c0_i32_0 = arith.constant 0 : i32
    %c0_i32_1 = arith.constant 0 : i32
    return %c0_i32, %c0_i32_0 : i32, i32
  }
  func.func @transform_3(%arg0: i32) -> (i32, i32) {
    %c0_i32 = arith.constant 0 : i32
    %c0_i32_0 = arith.constant 0 : i32
    return %arg0, %c0_i32 : i32, i32
  }
}

</mosaic_0001>

<bundles_post_ra>
// kernel: tpu_custom_call.1
= control target key start
LH: loop header
LB: loop body
LE: loop exit
PB: predicated region body
PF: predicated region fallthrough
CT: control target
= control target key end

     0   :  { %8 = vsyncpa [#allocation3], 0  ;;  %s461_s0 = inlined_call_operand.hbm [shape: f32[8,128], index: 0, kind: input, shape index: {}]   ;;  %s462_s1 = inlined_call_operand.hbm [shape: bf16[128,256], index: 1, kind: input, shape index: {}]   ;;  %s463_s2 = inlined_call_operand.hbm [shape: f32[1,256], index: 2, kind: input, shape index: {}]   ;;  %s464_s3 = inlined_call_operand.hbm [shape: f32[8,128], index: 3, kind: output, shape index: {}]  }
   0x1   :  { %9 = vsyncpa [#allocation6], 0  ;;  %s26_s14 = sshll.u32 %s462_s1, 4  ;;  %s27_s14 = int_to_ptr.hbm [resolvable:$true] %s26_s14 }
   0x2   :  { %10 = vsyncpa [#allocation4], 0  ;;  %s423_s15 = smov [#allocation5]   ;;  %s16_s19 = sshll.u32 %s461_s0, 4  ;;  %s17_s19 = int_to_ptr.hbm [resolvable:$true] %s16_s19 }
   0x3   :  { %s28_s16 = sshll.u32 %s423_s15, 4  ;;  %s424_s20 = smov 128   ;;  %s29_s16 = int_to_ptr.vmem [resolvable:$true] %s28_s16 }
   0x4   :  { %s425_s21 = smov 8   ;;  %s426_s22 = smov [#allocation2]  }
   0x5   :  { %34 = dma.hbm_to_vmem [thread:$0]  %s27_s14, 2048, %s29_s16, [#allocation6], %s424_s20, %s424_s20, %s425_s21  }
   0x6   :  { %s18_s23 = sshll.u32 %s426_s22, 4  ;;  %s40_s26 = sshll.u32 %s463_s2, 4  ;;  %s19_s23 = int_to_ptr.vmem [resolvable:$true] %s18_s23  ;;  %s41_s26 = int_to_ptr.hbm [resolvable:$true] %s40_s26 }
   0x7   :  { %21 = dma.hbm_to_vmem [thread:$0]  %s17_s19, 128, %s19_s23, [#allocation3]  }
   0x8   :  { %s427_s1 = smov [#allocation7]  }
   0x9   :  { %s42_s27 = sshll.u32 %s427_s1, 4  ;;  %s43_s27 = int_to_ptr.vmem [resolvable:$true] %s42_s27 }
   0xa   :  { %45 = dma.hbm_to_vmem [thread:$0]  %s41_s26, 32, %s43_s27, [#allocation6]  }
   0xb   :  { %417 = dma.done.wait [#allocation3], 128  }
   0xc   :  { %418 = vsyncadd [#allocation3], 4294967168 }
   0xd   :  { %419 = dma.done.wait [#allocation6], 2080  }
   0xe   :  { %420 = vsyncadd [#allocation6], 4294965216  ;;  %v309_v0 = vld [vmem:[#allocation5 + $0x74] sm:$0xf]  ;;  %v290_v1 = vld [vmem:[#allocation5 + $0x78] sm:$0xf0] }
   0xf   :  { %v307_v2 = vld [vmem:[#allocation5 + $0x64] sm:$0xf]  ;;  %v293_v3 = vor.u32 %v309_v0, %v290_v1  ;;  %v282_v4 = vld [vmem:[#allocation5 + $0x68] sm:$0xf0]  ;;  %v288_v5 = vld [vmem:[#allocation5 + $0x70] sm:$0xf] }
  0x10   :  { %v285_v6 = vor.u32 %v307_v2, %v282_v4  ;;  %v305_v7 = vld [vmem:[#allocation5 + $0x54] sm:$0xf]  ;;  %v310_v8 = vld [vmem:[#allocation5 + $0x74] sm:$0xf0]  ;;  %v274_v9 = vld [vmem:[#allocation5 + $0x58] sm:$0xf0] }
  0x11   :  { %175 = vmatpush.bf16.msra.mxu1 %v293_v3  ;;  %v289_v10 = vor.u32 %v310_v8, %v288_v5  ;;  %v280_v11 = vld [vmem:[#allocation5 + $0x60] sm:$0xf]  ;;  %v308_v12 = vld [vmem:[#allocation5 + $0x64] sm:$0xf0]  ;;  %v277_v14 = vor.u32 %v305_v7, %v274_v9  ;;  %v272_v15 = vld [vmem:[#allocation5 + $0x50] sm:$0xf] }
  0x12   :  { %v281_v13 = vor.u32 %v308_v12, %v280_v11  ;;  %v306_v16 = vld [vmem:[#allocation5 + $0x54] sm:$0xf0]  ;;  %v303_v17 = vld [vmem:[#allocation5 + $0x44] sm:$0xf]  ;;  %v266_v18 = vld [vmem:[#allocation5 + $0x48] sm:$0xf0] }
  0x13   :  { %162 = vmatpush.bf16.msra.mxu0 %v289_v10  ;;  %v273_v19 = vor.u32 %v306_v16, %v272_v15  ;;  %v269_v20 = vor.u32 %v303_v17, %v266_v18  ;;  %v264_v21 = vld [vmem:[#allocation5 + $0x40] sm:$0xf]  ;;  %v304_v22 = vld [vmem:[#allocation5 + $0x44] sm:$0xf0]  ;;  %v301_v23 = vld [vmem:[#allocation5 + $0x34] sm:$0xf] }
  0x14   :  { %v258_v24 = vld [vmem:[#allocation5 + $0x38] sm:$0xf0]  ;;  %v265_v25 = vor.u32 %v304_v22, %v264_v21  ;;  %v256_v27 = vld [vmem:[#allocation5 + $0x30] sm:$0xf]  ;;  %v302_v28 = vld [vmem:[#allocation5 + $0x34] sm:$0xf0] }
  0x15   :  { %176 = vmatpush.bf16.msra.mxu1 %v285_v6  ;;  %v261_v26 = vor.u32 %v301_v23, %v258_v24  ;;  %v299_v29 = vld [vmem:[#allocation5 + $0x24] sm:$0xf]  ;;  %v250_v30 = vld [vmem:[#allocation5 + $0x28] sm:$0xf0]  ;;  %v257_v31 = vor.u32 %v302_v28, %v256_v27  ;;  %v248_v33 = vld [vmem:[#allocation5 + $0x20] sm:$0xf] }
  0x16   :  { %v253_v32 = vor.u32 %v299_v29, %v250_v30  ;;  %v300_v34 = vld [vmem:[#allocation5 + $0x24] sm:$0xf0]  ;;  %v297_v35 = vld [vmem:[#allocation5 + $0x14] sm:$0xf]  ;;  %v242_v36 = vld [vmem:[#allocation5 + $0x18] sm:$0xf0] }
  0x17   :  { %163 = vmatpush.bf16.msra.mxu0 %v281_v13  ;;  %v249_v37 = vor.u32 %v300_v34, %v248_v33  ;;  %v245_v38 = vor.u32 %v297_v35, %v242_v36  ;;  %v240_v39 = vld [vmem:[#allocation5 + $0x10] sm:$0xf]  ;;  %v298_v40 = vld [vmem:[#allocation5 + $0x14] sm:$0xf0]  ;;  %v295_v41 = vld [vmem:[#allocation5 + $0x4] sm:$0xf] }
  0x18   :  { %v234_v42 = vld [vmem:[#allocation5 + $0x8] sm:$0xf0]  ;;  %v241_v43 = vor.u32 %v298_v40, %v240_v39  ;;  %v58_v45 = vld [vmem:[#allocation2] sm:$0xff]  ;;  %v232_v46 = vld [vmem:[#allocation5] sm:$0xf]  ;;  %s428_s0 = smov [#allocation8]  }
  0x19   :  { %177 = vmatpush.bf16.msra.mxu1 %v277_v14  ;;  %v237_v44 = vor.u32 %v295_v41, %v234_v42  ;;  %v296_v47 = vld [vmem:[#allocation5 + $0x4] sm:$0xf0]  ;;  %v59_v48 = vpack.c.bf16 %v58_v45, %v58_v45  ;;  %v76_v50 = vld [vmem:[#allocation7] sm:$0x3]  ;;  %s217_s2 = sshll.u32 %s428_s0, 4  ;;  %s219_s30 = sshll.u32 %s464_s3, 4  ;;  %s218_s2 = int_to_ptr.vmem [resolvable:$true] %s217_s2  ;;  %s220_s30 = int_to_ptr.hbm [resolvable:$true] %s219_s30 }
  0x1a   :  { %v233_v49 = vor.u32 %v296_v47, %v232_v46  ;;  %v79_v51 = vperm.slane %v76_v50, 1  ;;  %v78_v60 = vperm.slane %v76_v50, 0 }
  0x1b   :  { %164 = vmatpush.bf16.msra.mxu0 %v273_v19 }
  0x1d   :  { %178 = vmatpush.bf16.msra.mxu1 %v269_v20 }
  0x1f   :  { %165 = vmatpush.bf16.msra.mxu0 %v265_v25 }
  0x21   :  { %179 = vmatpush.bf16.msra.mxu1 %v261_v26 }
  0x23   :  { %166 = vmatpush.bf16.msra.mxu0 %v257_v31 }
  0x25   :  { %180 = vmatpush.bf16.msra.mxu1 %v253_v32 }
  0x27   :  { %167 = vmatpush.bf16.msra.mxu0 %v249_v37 }
  0x29   :  { %181 = vmatpush.bf16.msra.mxu1 %v245_v38 }
  0x2b   :  { %168 = vmatpush.bf16.msra.mxu0 %v241_v43 }
  0x2d   :  { %182 = vmatpush.bf16.msra.mxu1 %v237_v44 }
  0x2f   :  { %169 = vmatpush.bf16.msra.mxu0 %v233_v49 }
  0x30   :  { %183 = vmatmul.bf16.vlgmr.msra.gmra.mxu1 %v59_v48 }
  0x32   :  { %170 = vmatmul.bf16.vlgmr.msra.gmra.mxu0 %v59_v48 }
  0xad   :  { %v184_v52 = vpop.f32.mrf.mxu1 }
  0xae   :  { %v185_v53 = vadd.f32 %v184_v52, %v79_v51 }
  0xaf   :  { %v171_v55 = vpop.f32.mrf.mxu0 }
  0xb0   :  { %v294_v54 = vmul.f32 -1.442695, %v185_v53  ;;  %v172_v61 = vadd.f32 %v171_v55, %v78_v60 }
  0xb2   :  { %317 = vpow2.f32 %v294_v54  ;;  %v188_v1 = vmax.f32 %v172_v61, 0.0 }
  0xb4   :  { %v208_v6 = vsub.f32 %v188_v1, %v58_v45 }
  0xb5   :  { %v186_v56 = vpop.f32.mrf.mxu1 }
  0xb7   :  { %v173_v58 = vpop.f32.mrf.mxu0 }
  0xb8   :  { %v318_v57 = vpop.eup %317 }
  0xb9   :  { %v192_v59 = vadd.f32 1.0, %v318_v57 }
  0xbb   :  { %319 = vrcp.f32 %v192_v59  ;;  %v204_v2 = vand.u32 2147483648, %v192_v59  ;;  %v202_v4 = vand.u32 2147483647, %v192_v59  ;;  %vm198_vm1 = vweird.f32 %v192_v59 }
  0xbd   :  { %v205_v7 = vor.u32 1.1754944e-38, %v204_v2  ;;  %vm203_vm3 = vcmp.eq.f32.partialorder %v202_v4, 8.507059e+37 }
  0xc1   :  { %v320_v62 = vpop.eup %319 }
  0xc2   :  { %v194_v63 = vmul.f32 %v320_v62, %v192_v59  ;;  %vm199_vm0 = vweird.f32 %v320_v62 }
  0xc3   :  { %vm200_vm2 = vmor %vm198_vm1, %vm199_vm0 }
  0xc4   :  { %v195_v0 = vsub.f32 1.0, %v194_v63 }
  0xc6   :  { %v196_v3 = vmul.f32 %v320_v62, %v195_v0 }
  0xc8   :  { %v197_v5 = vadd.f32 %v320_v62, %v196_v3 }
  0xca   :  { %v201_v8 = vsel %vm200_vm2, %v320_v62, %v197_v5 }
  0xcb   :  { %v206_v9 = vsel %vm203_vm3, %v205_v7, %v201_v8 }
  0xcc   :  { %v209_v10 = vmul.f32 %v208_v6, %v206_v9 }
  0xce   :  { %v210_v11 = vadd.f32 %v209_v10, %v58_v45 }
  0xd0   :  { %211 = vst [vmem:[#allocation8] sm:$0xff] %v210_v11 }
  0xd1   :  { %222 = dma.vmem_to_hbm [thread:$0]  %s218_s2, 128, %s220_s30, [#allocation4]  }
  0xd2   :  { %421 = dma.done.wait [#allocation4], 128  }
  0xd3   :  { %422 = vsyncadd [#allocation4], 4294967168 }
  0xd4   :  { %227 = vsyncpa [#allocation3], 1 }
  0xd5   :  { %228 = vsyncpa [#allocation6], 1 }
  0xd6   :  { %229 = vsyncpa [#allocation4], 1 }

</bundles_post_ra>
